<compile_context>
chip_gen: v5e
topology: v5e:2x2
jax: 0.10.0
libtpu: 0.0.40
codegen_flags: <defaults>
</compile_context>

<pallas_src>
import functools
import math

import jax
import jax.numpy as jnp
from jax import lax
from jax.experimental import pallas as pl
from jax.experimental.pallas import tpu as pltpu


# ----------------------------------------------------------------------------
# Fused kernel: one (batch element, query tile) per grid step
# ----------------------------------------------------------------------------
def encoder_layer_kernel(xq_ref, xkv_ref, mask_ref,
                         wq_ref, wkv_ref, wo_ref,
                         ln1_g_ref, ln1_b_ref,
                         w1_ref, b1_ref, w2_ref, b2_ref,
                         ln2_g_ref, ln2_b_ref,
                         y_ref, att_ref,
                         *, num_heads, d_head, eps):
    """Fused EncoderLayer forward for one (batch, query-tile) grid step.

    xq_ref:   (1, Sq, D)       query rows of this tile (f32)
    xkv_ref:  (1, S,  D)       full sequence (keys / values source, f32)
    mask_ref: (1, 1, 1, S)     padding mask (nonzero = ignore that key)
    wq_ref:   (D, D)  bf16     query projection
    wkv_ref:  (D, 2D) bf16     fused [Wk | Wv]
    wo_ref:   (D, D)  bf16     output projection
    w1/w2:    (D,Dff)/(Dff,D)  bf16 FFN weights; biases / LN params f32
    y_ref:    (1, Sq, D)       block output
    att_ref:  (1, H, Sq, S)    attention matrix output
    """
    H, dh = num_heads, d_head
    f32, bf16 = jnp.float32, jnp.bfloat16

    xq = xq_ref[0]                                       # (Sq, D) f32
    xkv = xkv_ref[0]                                     # (S,  D) f32
    Sq, D = xq.shape

    # ---- projections: full-width lane-dense MXU matmuls, bf16 in / f32 acc ----
    q = jnp.dot(xq.astype(bf16), wq_ref[...], preferred_element_type=f32)    # (Sq, D)
    kv = jnp.dot(xkv.astype(bf16), wkv_ref[...], preferred_element_type=f32)  # (S, 2D)
    k = kv[:, :D]
    v = kv[:, D:]

    # ---- split heads (layout plumbing only; weights stayed full-width) ----
    def heads(t):                                        # (N, D) -> (H, N, dh)
        return jnp.stack([t[:, h * dh:(h + 1) * dh] for h in range(H)], axis=0)

    qh, kh, vh = heads(q), heads(k), heads(v)            # (H, Sq|S, dh)

    # ---- scores + masked softmax (statistics in f32) ----
    scale = jnp.float32(1.0 / math.sqrt(dh))
    s = jnp.einsum('hqf,hkf->hqk', qh.astype(bf16), kh.astype(bf16),
                   preferred_element_type=f32) * scale   # (H, Sq, S)

    # Large finite negative instead of -inf so fully masked rows cannot NaN
    # (documented divergence: such rows become uniform instead of NaN).
    m = mask_ref[0, 0]                                   # (1, S)
    s = s + jnp.where(m != 0, jnp.float32(-1e30), jnp.float32(0.0))

    s = s - jnp.max(s, axis=-1, keepdims=True)
    p = jnp.exp(s)
    att = p * pl.reciprocal(jnp.sum(p, axis=-1, keepdims=True), approx=True)
    att_ref[0] = att                                     # single dense store

    # ---- context + ONE full-width output projection ----
    ctx = jnp.einsum('hqk,hkf->hqf', att.astype(bf16), vh.astype(bf16),
                     preferred_element_type=f32)         # (H, Sq, dh)
    ctx2d = jnp.concatenate([ctx[h] for h in range(H)], axis=-1)   # (Sq, D)
    att_out = jnp.dot(ctx2d.astype(bf16), wo_ref[...], preferred_element_type=f32)

    # TODO(synk): dropout_1 / dropout_2 treated as identity (eval mode).

    # ---- add & LayerNorm 1 (f32) ----
    h1 = att_out + xq
    mu1 = jnp.mean(h1, axis=-1, keepdims=True)
    var1 = jnp.mean((h1 - mu1) * (h1 - mu1), axis=-1, keepdims=True)
    a1 = (h1 - mu1) * lax.rsqrt(var1 + eps) * ln1_g_ref[...] + ln1_b_ref[...]

    # ---- position-wise FFN (bf16 MXU, f32 bias / ReLU) ----
    ff = jnp.dot(a1.astype(bf16), w1_ref[...], preferred_element_type=f32) + b1_ref[...]
    ff = jnp.maximum(ff, 0.0)
    y2 = jnp.dot(ff.astype(bf16), w2_ref[...], preferred_element_type=f32) + b2_ref[...]

    # ---- add & LayerNorm 2 (f32) ----
    h2 = y2 + a1
    mu2 = jnp.mean(h2, axis=-1, keepdims=True)
    var2 = jnp.mean((h2 - mu2) * (h2 - mu2), axis=-1, keepdims=True)
    y_ref[0] = (h2 - mu2) * lax.rsqrt(var2 + eps) * ln2_g_ref[...] + ln2_b_ref[...]


# ----------------------------------------------------------------------------
# Wrapper (pallas_call plumbing)
# ----------------------------------------------------------------------------
def encoder_layer_pallas(x, padding_mask, params, num_heads, eps=1e-12):
    B, S, D = x.shape
    assert D % num_heads == 0
    dh = D // num_heads
    Dff = params["ff_w1"].shape[1]

    # Query tiling: only an (H, Sq, S) attention block must fit in VMEM.
    q_tile = 128 if S % 128 == 0 else S
    nq = S // q_tile

    # Weights cast to bf16 once (halves DMA + resident VMEM); K and V fused.
    bf16 = jnp.bfloat16
    wq = params["wq"].astype(bf16)                                            # (D, D)
    wkv = jnp.concatenate([params["wk"], params["wv"]], axis=1).astype(bf16)  # (D, 2D)
    wo = params["wo"].astype(bf16)                                            # (D, D)
    w1 = params["ff_w1"].astype(bf16)                                         # (D, Dff)
    w2 = params["ff_w2"].astype(bf16)                                         # (Dff, D)

    kernel = functools.partial(encoder_layer_kernel,
                               num_heads=num_heads, d_head=dh, eps=eps)

    def const(shape):   # resident weights: constant index_map -> DMA'd once
        return pl.BlockSpec(shape, lambda b, qi: (0,) * len(shape))

    y, att = pl.pallas_call(
        kernel,
        out_shape=(jax.ShapeDtypeStruct((B, S, D), jnp.float32),
                   jax.ShapeDtypeStruct((B, num_heads, S, S), jnp.float32)),
        grid=(B, nq),
        in_specs=[
            pl.BlockSpec((1, q_tile, D), lambda b, qi: (b, qi, 0)),   # queries
            pl.BlockSpec((1, S, D), lambda b, qi: (b, 0, 0)),         # keys/values
            pl.BlockSpec((1, 1, 1, S), lambda b, qi: (b, 0, 0, 0)),   # padding mask
            const((D, D)), const((D, 2 * D)), const((D, D)),
            const((1, D)), const((1, D)),
            const((D, Dff)), const((1, Dff)), const((Dff, D)), const((1, D)),
            const((1, D)), const((1, D)),
        ],
        out_specs=[
            pl.BlockSpec((1, q_tile, D), lambda b, qi: (b, qi, 0)),
            pl.BlockSpec((1, num_heads, q_tile, S), lambda b, qi: (b, 0, qi, 0)),
        ],
        compiler_params=pltpu.CompilerParams(
            dimension_semantics=("parallel", "parallel"),
            vmem_limit_bytes=64 * 1024 * 1024),
    )(x, x, padding_mask,
      wq, wkv, wo,
      params["ln1_g"], params["ln1_b"],
      w1, params["ff_b1"], w2, params["ff_b2"],
      params["ln2_g"], params["ln2_b"])
    return y, att


# ----------------------------------------------------------------------------
# Pure-JAX reference for correctness check.
# It applies the SAME bf16 rounding of MXU operands as the kernel, so the
# comparison stays tight; the only remaining deltas are MXU accumulation
# order and the approximate reciprocal used in the softmax normalisation.
# ----------------------------------------------------------------------------
def _bf(a):
    return a.astype(jnp.bfloat16).astype(jnp.float32)


def _ref_ln(h, g, b, eps):
    mu = jnp.mean(h, axis=-1, keepdims=True)
    var = jnp.mean((h - mu) ** 2, axis=-1, keepdims=True)
    return (h - mu) * lax.rsqrt(var + eps) * g + b


def ref_encoder_layer(x, mask, params, H, eps=1e-12):
    B, S, D = x.shape
    dh = D // H
    Q = _bf(x) @ _bf(params["wq"])
    K = _bf(x) @ _bf(params["wk"])
    V = _bf(x) @ _bf(params["wv"])
    Qh = Q.reshape(B, S, H, dh).transpose(0, 2, 1, 3)
    Kh = K.reshape(B, S, H, dh).transpose(0, 2, 1, 3)
    Vh = V.reshape(B, S, H, dh).transpose(0, 2, 1, 3)
    s = jnp.einsum("bhqd,bhkd->bhqk", _bf(Qh), _bf(Kh)) * jnp.float32(1.0 / math.sqrt(dh))
    s = jnp.where(mask != 0, jnp.float32(-1e30), s)
    a = jax.nn.softmax(s, axis=-1)
    o = jnp.einsum("bhqk,bhkd->bhqd", _bf(a), _bf(Vh))
    o = o.transpose(0, 2, 1, 3).reshape(B, S, D)
    att_out = _bf(o) @ _bf(params["wo"])
    a1 = _ref_ln(att_out + x, params["ln1_g"], params["ln1_b"], eps)
    ff = jnp.maximum(_bf(a1) @ _bf(params["ff_w1"]) + params["ff_b1"], 0.0)
    y = _bf(ff) @ _bf(params["ff_w2"]) + params["ff_b2"]
    y = _ref_ln(y + a1, params["ln2_g"], params["ln2_b"], eps)
    return y, a


# ----------------------------------------------------------------------------
# Main
# ----------------------------------------------------------------------------
if __name__ == "__main__":
    B, S = 2, 8
    D, H, Dff = 32, 4, 64

    key = jax.random.PRNGKey(0)
    keys = jax.random.split(key, 16)

    def init_w(k, shape, fan_in):
        return jax.random.normal(k, shape, jnp.float32) / math.sqrt(fan_in)

    params = {
        # linear weights pre-transposed to (in_features, out_features): x @ W
        "wq": init_w(keys[0], (D, D), D),
        "wk": init_w(keys[1], (D, D), D),
        "wv": init_w(keys[2], (D, D), D),
        "wo": init_w(keys[3], (D, D), D),
        "ln1_g": 1.0 + 0.1 * jax.random.normal(keys[4], (1, D), jnp.float32),
        "ln1_b": 0.1 * jax.random.normal(keys[5], (1, D), jnp.float32),
        "ff_w1": init_w(keys[6], (D, Dff), D),
        "ff_b1": init_w(keys[7], (1, Dff), D),
        "ff_w2": init_w(keys[8], (Dff, D), Dff),
        "ff_b2": init_w(keys[9], (1, D), Dff),
        "ln2_g": 1.0 + 0.1 * jax.random.normal(keys[10], (1, D), jnp.float32),
        "ln2_b": 0.1 * jax.random.normal(keys[11], (1, D), jnp.float32),
    }

    x = jax.random.normal(keys[12], (B, S, D), jnp.float32)
    # padding_mask: 1 where encoder positions are padding (last 2 positions)
    padding_mask = jnp.zeros((B, 1, 1, S), jnp.float32).at[..., S - 2:].set(1.0)

    y, att = encoder_layer_pallas(x, padding_mask, params, H)
    jax.block_until_ready((y, att))

    y_ref, att_ref = ref_encoder_layer(x, padding_mask, params, H)

    assert y.shape == (B, S, D)
    assert att.shape == (B, H, S, S)
    assert bool(jnp.all(jnp.isfinite(y))) and bool(jnp.all(jnp.isfinite(att)))
    # Tolerances cover the approximate-reciprocal softmax normalisation and
    # bf16-MXU accumulation-order differences vs. the bf16-matched reference.
    assert jnp.allclose(att, att_ref, atol=1e-2, rtol=1e-2)
    assert jnp.allclose(y, y_ref, atol=2e-2, rtol=2e-2)

    print("KERNEL_OK")
</pallas_src>

<mosaic_0001>
module attributes {stable_mosaic.version = 11 : i64} {
  func.func @encoder_layer_kernel(%arg0: i32, %arg1: i32, %arg2: memref<1x8x32xf32, #tpu.memory_space<vmem>>, %arg3: memref<1x8x32xf32, #tpu.memory_space<vmem>>, %arg4: memref<1x1x1x8xf32, #tpu.memory_space<vmem>>, %arg5: memref<32x32xbf16, #tpu.memory_space<vmem>>, %arg6: memref<32x64xbf16, #tpu.memory_space<vmem>>, %arg7: memref<32x32xbf16, #tpu.memory_space<vmem>>, %arg8: memref<1x32xf32, #tpu.memory_space<vmem>>, %arg9: memref<1x32xf32, #tpu.memory_space<vmem>>, %arg10: memref<32x64xbf16, #tpu.memory_space<vmem>>, %arg11: memref<1x64xf32, #tpu.memory_space<vmem>>, %arg12: memref<64x32xbf16, #tpu.memory_space<vmem>>, %arg13: memref<1x32xf32, #tpu.memory_space<vmem>>, %arg14: memref<1x32xf32, #tpu.memory_space<vmem>>, %arg15: memref<1x32xf32, #tpu.memory_space<vmem>>, %arg16: memref<1x8x32xf32, #tpu.memory_space<vmem>>, %arg17: memref<1x4x8x8xf32, #tpu.memory_space<vmem>>) attributes {dimension_semantics = [#tpu.dimension_semantics<parallel>, #tpu.dimension_semantics<parallel>], iteration_bounds = array<i64: 2, 1>, scalar_prefetch = 0 : i64, scratch_operands = 0 : i64, tpu.core_type = #tpu.core_type<tc>, window_params = [{transform_indices = @transform_0, window_bounds = array<i64: 1, 8, 32>}, {transform_indices = @transform_1, window_bounds = array<i64: 1, 8, 32>}, {transform_indices = @transform_2, window_bounds = array<i64: 1, 1, 1, 8>}, {pipeline_mode = #tpu.pipeline_mode<synchronous>, transform_indices = @transform_3, window_bounds = array<i64: 32, 32>}, {pipeline_mode = #tpu.pipeline_mode<synchronous>, transform_indices = @transform_4, window_bounds = array<i64: 32, 64>}, {pipeline_mode = #tpu.pipeline_mode<synchronous>, transform_indices = @transform_5, window_bounds = array<i64: 32, 32>}, {pipeline_mode = #tpu.pipeline_mode<synchronous>, transform_indices = @transform_6, window_bounds = array<i64: 1, 32>}, {pipeline_mode = #tpu.pipeline_mode<synchronous>, transform_indices = @transform_7, window_bounds = array<i64: 1, 32>}, {pipeline_mode = #tpu.pipeline_mode<synchronous>, transform_indices = @transform_8, window_bounds = array<i64: 32, 64>}, {pipeline_mode = #tpu.pipeline_mode<synchronous>, transform_indices = @transform_9, window_bounds = array<i64: 1, 64>}, {pipeline_mode = #tpu.pipeline_mode<synchronous>, transform_indices = @transform_10, window_bounds = array<i64: 64, 32>}, {pipeline_mode = #tpu.pipeline_mode<synchronous>, transform_indices = @transform_11, window_bounds = array<i64: 1, 32>}, {pipeline_mode = #tpu.pipeline_mode<synchronous>, transform_indices = @transform_12, window_bounds = array<i64: 1, 32>}, {pipeline_mode = #tpu.pipeline_mode<synchronous>, transform_indices = @transform_13, window_bounds = array<i64: 1, 32>}, {transform_indices = @transform_14, window_bounds = array<i64: 1, 8, 32>}, {transform_indices = @transform_15, window_bounds = array<i64: 1, 4, 8, 8>}]} {
    %c0 = arith.constant 0 : index
    %c0_0 = arith.constant 0 : index
    %c0_1 = arith.constant 0 : index
    %0 = vector.load %arg2[%c0, %c0_0, %c0_1] : memref<1x8x32xf32, #tpu.memory_space<vmem>>, vector<1x8x32xf32>
    %1 = vector.shape_cast %0 : vector<1x8x32xf32> to vector<8x32xf32>
    %c0_2 = arith.constant 0 : index
    %c0_3 = arith.constant 0 : index
    %c0_4 = arith.constant 0 : index
    %2 = vector.load %arg3[%c0_2, %c0_3, %c0_4] : memref<1x8x32xf32, #tpu.memory_space<vmem>>, vector<1x8x32xf32>
    %3 = vector.shape_cast %2 : vector<1x8x32xf32> to vector<8x32xf32>
    %4 = arith.truncf %1 : vector<8x32xf32> to vector<8x32xbf16>
    %c0_5 = arith.constant 0 : index
    %c0_6 = arith.constant 0 : index
    %5 = vector.load %arg5[%c0_5, %c0_6] : memref<32x32xbf16, #tpu.memory_space<vmem>>, vector<32x32xbf16>
    %cst = arith.constant dense<0.000000e+00> : vector<8x32xf32>
    %6 = tpu.matmul %4, %5, %cst {dimension_numbers = #tpu.dot_dimension_numbers<[1], [0], [0], [1], [0, 0, 1, 1], [], []>} : vector<8x32xbf16>, vector<32x32xbf16>, vector<8x32xf32> -> vector<8x32xf32>
    %7 = arith.truncf %3 : vector<8x32xf32> to vector<8x32xbf16>
    %c0_7 = arith.constant 0 : index
    %c0_8 = arith.constant 0 : index
    %8 = vector.load %arg6[%c0_7, %c0_8] : memref<32x64xbf16, #tpu.memory_space<vmem>>, vector<32x64xbf16>
    %cst_9 = arith.constant dense<0.000000e+00> : vector<8x64xf32>
    %9 = tpu.matmul %7, %8, %cst_9 {dimension_numbers = #tpu.dot_dimension_numbers<[1], [0], [0], [1], [0, 0, 1, 1], [], []>} : vector<8x32xbf16>, vector<32x64xbf16>, vector<8x64xf32> -> vector<8x64xf32>
    %10 = vector.extract_strided_slice %9 {offsets = [0, 0], sizes = [8, 32], strides = [1, 1]} : vector<8x64xf32> to vector<8x32xf32>
    %11 = vector.extract_strided_slice %9 {offsets = [0, 32], sizes = [8, 32], strides = [1, 1]} : vector<8x64xf32> to vector<8x32xf32>
    %12 = vector.extract_strided_slice %6 {offsets = [0, 0], sizes = [8, 8], strides = [1, 1]} : vector<8x32xf32> to vector<8x8xf32>
    %13 = vector.extract_strided_slice %6 {offsets = [0, 8], sizes = [8, 8], strides = [1, 1]} : vector<8x32xf32> to vector<8x8xf32>
    %14 = vector.extract_strided_slice %6 {offsets = [0, 16], sizes = [8, 8], strides = [1, 1]} : vector<8x32xf32> to vector<8x8xf32>
    %15 = vector.extract_strided_slice %6 {offsets = [0, 24], sizes = [8, 8], strides = [1, 1]} : vector<8x32xf32> to vector<8x8xf32>
    %16 = vector.shape_cast %12 : vector<8x8xf32> to vector<1x8x8xf32>
    %17 = vector.shape_cast %13 : vector<8x8xf32> to vector<1x8x8xf32>
    %18 = vector.shape_cast %14 : vector<8x8xf32> to vector<1x8x8xf32>
    %19 = vector.shape_cast %15 : vector<8x8xf32> to vector<1x8x8xf32>
    %20 = tpu.concatenate %16, %17, %18, %19 in 0 : vector<1x8x8xf32>, vector<1x8x8xf32>, vector<1x8x8xf32>, vector<1x8x8xf32> -> vector<4x8x8xf32>
    %21 = vector.extract_strided_slice %10 {offsets = [0, 0], sizes = [8, 8], strides = [1, 1]} : vector<8x32xf32> to vector<8x8xf32>
    %22 = vector.extract_strided_slice %10 {offsets = [0, 8], sizes = [8, 8], strides = [1, 1]} : vector<8x32xf32> to vector<8x8xf32>
    %23 = vector.extract_strided_slice %10 {offsets = [0, 16], sizes = [8, 8], strides = [1, 1]} : vector<8x32xf32> to vector<8x8xf32>
    %24 = vector.extract_strided_slice %10 {offsets = [0, 24], sizes = [8, 8], strides = [1, 1]} : vector<8x32xf32> to vector<8x8xf32>
    %25 = vector.shape_cast %21 : vector<8x8xf32> to vector<1x8x8xf32>
    %26 = vector.shape_cast %22 : vector<8x8xf32> to vector<1x8x8xf32>
    %27 = vector.shape_cast %23 : vector<8x8xf32> to vector<1x8x8xf32>
    %28 = vector.shape_cast %24 : vector<8x8xf32> to vector<1x8x8xf32>
    %29 = tpu.concatenate %25, %26, %27, %28 in 0 : vector<1x8x8xf32>, vector<1x8x8xf32>, vector<1x8x8xf32>, vector<1x8x8xf32> -> vector<4x8x8xf32>
    %30 = vector.extract_strided_slice %11 {offsets = [0, 0], sizes = [8, 8], strides = [1, 1]} : vector<8x32xf32> to vector<8x8xf32>
    %31 = vector.extract_strided_slice %11 {offsets = [0, 8], sizes = [8, 8], strides = [1, 1]} : vector<8x32xf32> to vector<8x8xf32>
    %32 = vector.extract_strided_slice %11 {offsets = [0, 16], sizes = [8, 8], strides = [1, 1]} : vector<8x32xf32> to vector<8x8xf32>
    %33 = vector.extract_strided_slice %11 {offsets = [0, 24], sizes = [8, 8], strides = [1, 1]} : vector<8x32xf32> to vector<8x8xf32>
    %34 = vector.shape_cast %30 : vector<8x8xf32> to vector<1x8x8xf32>
    %35 = vector.shape_cast %31 : vector<8x8xf32> to vector<1x8x8xf32>
    %36 = vector.shape_cast %32 : vector<8x8xf32> to vector<1x8x8xf32>
    %37 = vector.shape_cast %33 : vector<8x8xf32> to vector<1x8x8xf32>
    %38 = tpu.concatenate %34, %35, %36, %37 in 0 : vector<1x8x8xf32>, vector<1x8x8xf32>, vector<1x8x8xf32>, vector<1x8x8xf32> -> vector<4x8x8xf32>
    %39 = arith.truncf %20 : vector<4x8x8xf32> to vector<4x8x8xbf16>
    %40 = arith.truncf %29 : vector<4x8x8xf32> to vector<4x8x8xbf16>
    "tpu.trace_start"() <{level = 10 : i32, message = "hqf,hkf->hqk"}> : () -> ()
    %cst_10 = arith.constant dense<0.000000e+00> : vector<4x8x8xf32>
    %41 = tpu.matmul %39, %40, %cst_10 {dimension_numbers = #tpu.dot_dimension_numbers<[2], [2], [1], [1], [0, 0, 0, 1, 1, 1], [0], [0]>} : vector<4x8x8xbf16>, vector<4x8x8xbf16>, vector<4x8x8xf32> -> vector<4x8x8xf32>
    "tpu.trace_stop"() : () -> ()
    %cst_11 = arith.constant 0.353553385 : f32
    %42 = vector.broadcast %cst_11 : f32 to vector<4x8x8xf32>
    %43 = arith.mulf %41, %42 : vector<4x8x8xf32>
    %c0_12 = arith.constant 0 : index
    %c0_13 = arith.constant 0 : index
    %c0_14 = arith.constant 0 : index
    %c0_15 = arith.constant 0 : index
    %44 = vector.load %arg4[%c0_12, %c0_13, %c0_14, %c0_15] : memref<1x1x1x8xf32, #tpu.memory_space<vmem>>, vector<1x1x1x8xf32>
    %45 = vector.shape_cast %44 : vector<1x1x1x8xf32> to vector<1x8xf32>
    %cst_16 = arith.constant 0.000000e+00 : f32
    %46 = vector.broadcast %cst_16 : f32 to vector<1x8xf32>
    %47 = arith.cmpf one, %45, %46 : vector<1x8xf32>
    %cst_17 = arith.constant -1.000000e+30 : f32
    %cst_18 = arith.constant 0.000000e+00 : f32
    %48 = vector.broadcast %cst_17 : f32 to vector<1x8xf32>
    %49 = vector.broadcast %cst_18 : f32 to vector<1x8xf32>
    %50 = arith.select %47, %48, %49 : vector<1x8xi1>, vector<1x8xf32>
    %51 = vector.shape_cast %50 : vector<1x8xf32> to vector<1x1x8xf32>
    %52 = vector.broadcast %51 : vector<1x1x8xf32> to vector<4x8x8xf32>
    %53 = arith.addf %43, %52 : vector<4x8x8xf32>
    %cst_19 = arith.constant dense<0xFF800000> : vector<4x8xf32>
    %54 = vector.multi_reduction <maximumf>, %53, %cst_19 [2] : vector<4x8x8xf32> to vector<4x8xf32>
    %55 = vector.shape_cast %54 : vector<4x8xf32> to vector<4x8x1xf32>
    %56 = vector.broadcast %55 : vector<4x8x1xf32> to vector<4x8x8xf32>
    %57 = arith.subf %53, %56 : vector<4x8x8xf32>
    %58 = math.exp %57 : vector<4x8x8xf32>
    %cst_20 = arith.constant dense<0.000000e+00> : vector<4x8xf32>
    %59 = vector.multi_reduction <add>, %58, %cst_20 [2] : vector<4x8x8xf32> to vector<4x8xf32>
    %60 = vector.shape_cast %59 : vector<4x8xf32> to vector<4x8x1xf32>
    %61 = tpu.reciprocal %60 {approx = true} : vector<4x8x1xf32> -> vector<4x8x1xf32>
    %62 = vector.broadcast %61 : vector<4x8x1xf32> to vector<4x8x8xf32>
    %63 = arith.mulf %58, %62 : vector<4x8x8xf32>
    %c0_21 = arith.constant 0 : index
    %c0_22 = arith.constant 0 : index
    %c0_23 = arith.constant 0 : index
    %c0_24 = arith.constant 0 : index
    %64 = vector.load %arg17[%c0_21, %c0_22, %c0_23, %c0_24] : memref<1x4x8x8xf32, #tpu.memory_space<vmem>>, vector<1x4x8x8xf32>
    %65 = vector.shape_cast %64 : vector<1x4x8x8xf32> to vector<4x8x8xf32>
    %66 = vector.shape_cast %63 : vector<4x8x8xf32> to vector<1x4x8x8xf32>
    tpu.vector_store %arg17[%c0_21, %c0_22, %c0_23, %c0_24], %66 {strides = array<i32>} : memref<1x4x8x8xf32, #tpu.memory_space<vmem>>, vector<1x4x8x8xf32>,
    %67 = arith.truncf %63 : vector<4x8x8xf32> to vector<4x8x8xbf16>
    %68 = arith.truncf %38 : vector<4x8x8xf32> to vector<4x8x8xbf16>
    "tpu.trace_start"() <{level = 10 : i32, message = "hqk,hkf->hqf"}> : () -> ()
    %cst_25 = arith.constant dense<0.000000e+00> : vector<4x8x8xf32>
    %69 = tpu.matmul %67, %68, %cst_25 {dimension_numbers = #tpu.dot_dimension_numbers<[2], [1], [1], [2], [0, 0, 0, 1, 1, 2], [0], [0]>} : vector<4x8x8xbf16>, vector<4x8x8xbf16>, vector<4x8x8xf32> -> vector<4x8x8xf32>
    "tpu.trace_stop"() : () -> ()
    %70 = vector.extract_strided_slice %69 {offsets = [0, 0, 0], sizes = [1, 8, 8], strides = [1, 1, 1]} : vector<4x8x8xf32> to vector<1x8x8xf32>
    %71 = vector.shape_cast %70 : vector<1x8x8xf32> to vector<8x8xf32>
    %72 = vector.extract_strided_slice %69 {offsets = [1, 0, 0], sizes = [1, 8, 8], strides = [1, 1, 1]} : vector<4x8x8xf32> to vector<1x8x8xf32>
    %73 = vector.shape_cast %72 : vector<1x8x8xf32> to vector<8x8xf32>
    %74 = vector.extract_strided_slice %69 {offsets = [2, 0, 0], sizes = [1, 8, 8], strides = [1, 1, 1]} : vector<4x8x8xf32> to vector<1x8x8xf32>
    %75 = vector.shape_cast %74 : vector<1x8x8xf32> to vector<8x8xf32>
    %76 = vector.extract_strided_slice %69 {offsets = [3, 0, 0], sizes = [1, 8, 8], strides = [1, 1, 1]} : vector<4x8x8xf32> to vector<1x8x8xf32>
    %77 = vector.shape_cast %76 : vector<1x8x8xf32> to vector<8x8xf32>
    %78 = tpu.concatenate %71, %73, %75, %77 in 1 : vector<8x8xf32>, vector<8x8xf32>, vector<8x8xf32>, vector<8x8xf32> -> vector<8x32xf32>
    %79 = arith.truncf %78 : vector<8x32xf32> to vector<8x32xbf16>
    %c0_26 = arith.constant 0 : index
    %c0_27 = arith.constant 0 : index
    %80 = vector.load %arg7[%c0_26, %c0_27] : memref<32x32xbf16, #tpu.memory_space<vmem>>, vector<32x32xbf16>
    %cst_28 = arith.constant dense<0.000000e+00> : vector<8x32xf32>
    %81 = tpu.matmul %79, %80, %cst_28 {dimension_numbers = #tpu.dot_dimension_numbers<[1], [0], [0], [1], [0, 0, 1, 1], [], []>} : vector<8x32xbf16>, vector<32x32xbf16>, vector<8x32xf32> -> vector<8x32xf32>
    %82 = arith.addf %81, %1 : vector<8x32xf32>
    %cst_29 = arith.constant dense<0.000000e+00> : vector<8xf32>
    %83 = vector.multi_reduction <add>, %82, %cst_29 [1] : vector<8x32xf32> to vector<8xf32>
    %84 = vector.shape_cast %83 : vector<8xf32> to vector<8x1xf32>
    %cst_30 = arith.constant 3.200000e+01 : f32
    %85 = vector.broadcast %cst_30 : f32 to vector<8x1xf32>
    %86 = arith.divf %84, %85 : vector<8x1xf32>
    %87 = vector.broadcast %86 : vector<8x1xf32> to vector<8x32xf32>
    %88 = arith.subf %82, %87 : vector<8x32xf32>
    %89 = vector.broadcast %86 : vector<8x1xf32> to vector<8x32xf32>
    %90 = arith.subf %82, %89 : vector<8x32xf32>
    %91 = arith.mulf %88, %90 : vector<8x32xf32>
    %cst_31 = arith.constant dense<0.000000e+00> : vector<8xf32>
    %92 = vector.multi_reduction <add>, %91, %cst_31 [1] : vector<8x32xf32> to vector<8xf32>
    %93 = vector.shape_cast %92 : vector<8xf32> to vector<8x1xf32>
    %cst_32 = arith.constant 3.200000e+01 : f32
    %94 = vector.broadcast %cst_32 : f32 to vector<8x1xf32>
    %95 = arith.divf %93, %94 : vector<8x1xf32>
    %96 = vector.broadcast %86 : vector<8x1xf32> to vector<8x32xf32>
    %97 = arith.subf %82, %96 : vector<8x32xf32>
    %cst_33 = arith.constant 9.99999996E-13 : f32
    %98 = vector.broadcast %cst_33 : f32 to vector<8x1xf32>
    %99 = arith.addf %95, %98 : vector<8x1xf32>
    %100 = math.rsqrt %99 : vector<8x1xf32>
    %101 = vector.broadcast %100 : vector<8x1xf32> to vector<8x32xf32>
    %102 = arith.mulf %97, %101 : vector<8x32xf32>
    %c0_34 = arith.constant 0 : index
    %c0_35 = arith.constant 0 : index
    %103 = vector.load %arg8[%c0_34, %c0_35] : memref<1x32xf32, #tpu.memory_space<vmem>>, vector<1x32xf32>
    %104 = vector.broadcast %103 : vector<1x32xf32> to vector<8x32xf32>
    %105 = arith.mulf %102, %104 : vector<8x32xf32>
    %c0_36 = arith.constant 0 : index
    %c0_37 = arith.constant 0 : index
    %106 = vector.load %arg9[%c0_36, %c0_37] : memref<1x32xf32, #tpu.memory_space<vmem>>, vector<1x32xf32>
    %107 = vector.broadcast %106 : vector<1x32xf32> to vector<8x32xf32>
    %108 = arith.addf %105, %107 : vector<8x32xf32>
    %109 = arith.truncf %108 : vector<8x32xf32> to vector<8x32xbf16>
    %c0_38 = arith.constant 0 : index
    %c0_39 = arith.constant 0 : index
    %110 = vector.load %arg10[%c0_38, %c0_39] : memref<32x64xbf16, #tpu.memory_space<vmem>>, vector<32x64xbf16>
    %cst_40 = arith.constant dense<0.000000e+00> : vector<8x64xf32>
    %111 = tpu.matmul %109, %110, %cst_40 {dimension_numbers = #tpu.dot_dimension_numbers<[1], [0], [0], [1], [0, 0, 1, 1], [], []>} : vector<8x32xbf16>, vector<32x64xbf16>, vector<8x64xf32> -> vector<8x64xf32>
    %c0_41 = arith.constant 0 : index
    %c0_42 = arith.constant 0 : index
    %112 = vector.load %arg11[%c0_41, %c0_42] : memref<1x64xf32, #tpu.memory_space<vmem>>, vector<1x64xf32>
    %113 = vector.broadcast %112 : vector<1x64xf32> to vector<8x64xf32>
    %114 = arith.addf %111, %113 : vector<8x64xf32>
    %cst_43 = arith.constant 0.000000e+00 : f32
    %115 = vector.broadcast %cst_43 : f32 to vector<8x64xf32>
    %116 = arith.maximumf %114, %115 : vector<8x64xf32>
    %117 = arith.truncf %116 : vector<8x64xf32> to vector<8x64xbf16>
    %c0_44 = arith.constant 0 : index
    %c0_45 = arith.constant 0 : index
    %118 = vector.load %arg12[%c0_44, %c0_45] : memref<64x32xbf16, #tpu.memory_space<vmem>>, vector<64x32xbf16>
    %cst_46 = arith.constant dense<0.000000e+00> : vector<8x32xf32>
    %119 = tpu.matmul %117, %118, %cst_46 {dimension_numbers = #tpu.dot_dimension_numbers<[1], [0], [0], [1], [0, 0, 1, 1], [], []>} : vector<8x64xbf16>, vector<64x32xbf16>, vector<8x32xf32> -> vector<8x32xf32>
    %c0_47 = arith.constant 0 : index
    %c0_48 = arith.constant 0 : index
    %120 = vector.load %arg13[%c0_47, %c0_48] : memref<1x32xf32, #tpu.memory_space<vmem>>, vector<1x32xf32>
    %121 = vector.broadcast %120 : vector<1x32xf32> to vector<8x32xf32>
    %122 = arith.addf %119, %121 : vector<8x32xf32>
    %123 = arith.addf %122, %108 : vector<8x32xf32>
    %cst_49 = arith.constant dense<0.000000e+00> : vector<8xf32>
    %124 = vector.multi_reduction <add>, %123, %cst_49 [1] : vector<8x32xf32> to vector<8xf32>
    %125 = vector.shape_cast %124 : vector<8xf32> to vector<8x1xf32>
    %cst_50 = arith.constant 3.200000e+01 : f32
    %126 = vector.broadcast %cst_50 : f32 to vector<8x1xf32>
    %127 = arith.divf %125, %126 : vector<8x1xf32>
    %128 = vector.broadcast %127 : vector<8x1xf32> to vector<8x32xf32>
    %129 = arith.subf %123, %128 : vector<8x32xf32>
    %130 = vector.broadcast %127 : vector<8x1xf32> to vector<8x32xf32>
    %131 = arith.subf %123, %130 : vector<8x32xf32>
    %132 = arith.mulf %129, %131 : vector<8x32xf32>
    %cst_51 = arith.constant dense<0.000000e+00> : vector<8xf32>
    %133 = vector.multi_reduction <add>, %132, %cst_51 [1] : vector<8x32xf32> to vector<8xf32>
    %134 = vector.shape_cast %133 : vector<8xf32> to vector<8x1xf32>
    %cst_52 = arith.constant 3.200000e+01 : f32
    %135 = vector.broadcast %cst_52 : f32 to vector<8x1xf32>
    %136 = arith.divf %134, %135 : vector<8x1xf32>
    %137 = vector.broadcast %127 : vector<8x1xf32> to vector<8x32xf32>
    %138 = arith.subf %123, %137 : vector<8x32xf32>
    %cst_53 = arith.constant 9.99999996E-13 : f32
    %139 = vector.broadcast %cst_53 : f32 to vector<8x1xf32>
    %140 = arith.addf %136, %139 : vector<8x1xf32>
    %141 = math.rsqrt %140 : vector<8x1xf32>
    %142 = vector.broadcast %141 : vector<8x1xf32> to vector<8x32xf32>
    %143 = arith.mulf %138, %142 : vector<8x32xf32>
    %c0_54 = arith.constant 0 : index
    %c0_55 = arith.constant 0 : index
    %144 = vector.load %arg14[%c0_54, %c0_55] : memref<1x32xf32, #tpu.memory_space<vmem>>, vector<1x32xf32>
    %145 = vector.broadcast %144 : vector<1x32xf32> to vector<8x32xf32>
    %146 = arith.mulf %143, %145 : vector<8x32xf32>
    %c0_56 = arith.constant 0 : index
    %c0_57 = arith.constant 0 : index
    %147 = vector.load %arg15[%c0_56, %c0_57] : memref<1x32xf32, #tpu.memory_space<vmem>>, vector<1x32xf32>
    %148 = vector.broadcast %147 : vector<1x32xf32> to vector<8x32xf32>
    %149 = arith.addf %146, %148 : vector<8x32xf32>
    %c0_58 = arith.constant 0 : index
    %c0_59 = arith.constant 0 : index
    %c0_60 = arith.constant 0 : index
    %150 = vector.load %arg16[%c0_58, %c0_59, %c0_60] : memref<1x8x32xf32, #tpu.memory_space<vmem>>, vector<1x8x32xf32>
    %151 = vector.shape_cast %150 : vector<1x8x32xf32> to vector<8x32xf32>
    %152 = vector.shape_cast %149 : vector<8x32xf32> to vector<1x8x32xf32>
    tpu.vector_store %arg16[%c0_58, %c0_59, %c0_60], %152 {strides = array<i32>} : memref<1x8x32xf32, #tpu.memory_space<vmem>>, vector<1x8x32xf32>,
    return
  }
  func.func @transform_0(%arg0: i32, %arg1: i32) -> (i32, i32, i32) {
    %c0_i32 = arith.constant 0 : i32
    %c0_i32_0 = arith.constant 0 : i32
    return %arg0, %arg1, %c0_i32 : i32, i32, i32
  }
  func.func @transform_1(%arg0: i32, %arg1: i32) -> (i32, i32, i32) {
    %c0_i32 = arith.constant 0 : i32
    %c0_i32_0 = arith.constant 0 : i32
    %c0_i32_1 = arith.constant 0 : i32
    return %arg0, %c0_i32, %c0_i32_0 : i32, i32, i32
  }
  func.func @transform_2(%arg0: i32, %arg1: i32) -> (i32, i32, i32, i32) {
    %c0_i32 = arith.constant 0 : i32
    %c0_i32_0 = arith.constant 0 : i32
    %c0_i32_1 = arith.constant 0 : i32
    %c0_i32_2 = arith.constant 0 : i32
    return %arg0, %c0_i32, %c0_i32_0, %c0_i32_1 : i32, i32, i32, i32
  }
  func.func @transform_3(%arg0: i32, %arg1: i32) -> (i32, i32) {
    %c0_i32 = arith.constant 0 : i32
    %c0_i32_0 = arith.constant 0 : i32
    %c0_i32_1 = arith.constant 0 : i32
    return %c0_i32, %c0_i32_0 : i32, i32
  }
  func.func @transform_4(%arg0: i32, %arg1: i32) -> (i32, i32) {
    %c0_i32 = arith.constant 0 : i32
    %c0_i32_0 = arith.constant 0 : i32
    %c0_i32_1 = arith.constant 0 : i32
    return %c0_i32, %c0_i32_0 : i32, i32
  }
  func.func @transform_5(%arg0: i32, %arg1: i32) -> (i32, i32) {
    %c0_i32 = arith.constant 0 : i32
    %c0_i32_0 = arith.constant 0 : i32
    %c0_i32_1 = arith.constant 0 : i32
    return %c0_i32, %c0_i32_0 : i32, i32
  }
  func.func @transform_6(%arg0: i32, %arg1: i32) -> (i32, i32) {
    %c0_i32 = arith.constant 0 : i32
    %c0_i32_0 = arith.constant 0 : i32
    %c0_i32_1 = arith.constant 0 : i32
    return %c0_i32, %c0_i32_0 : i32, i32
  }
  func.func @transform_7(%arg0: i32, %arg1: i32) -> (i32, i32) {
    %c0_i32 = arith.constant 0 : i32
    %c0_i32_0 = arith.constant 0 : i32
    %c0_i32_1 = arith.constant 0 : i32
    return %c0_i32, %c0_i32_0 : i32, i32
  }
  func.func @transform_8(%arg0: i32, %arg1: i32) -> (i32, i32) {
    %c0_i32 = arith.constant 0 : i32
    %c0_i32_0 = arith.constant 0 : i32
    %c0_i32_1 = arith.constant 0 : i32
    return %c0_i32, %c0_i32_0 : i32, i32
  }
  func.func @transform_9(%arg0: i32, %arg1: i32) -> (i32, i32) {
    %c0_i32 = arith.constant 0 : i32
    %c0_i32_0 = arith.constant 0 : i32
    %c0_i32_1 = arith.constant 0 : i32
    return %c0_i32, %c0_i32_0 : i32, i32
  }
  func.func @transform_10(%arg0: i32, %arg1: i32) -> (i32, i32) {
    %c0_i32 = arith.constant 0 : i32
    %c0_i32_0 = arith.constant 0 : i32
    %c0_i32_1 = arith.constant 0 : i32
    return %c0_i32, %c0_i32_0 : i32, i32
  }
  func.func @transform_11(%arg0: i32, %arg1: i32) -> (i32, i32) {
    %c0_i32 = arith.constant 0 : i32
    %c0_i32_0 = arith.constant 0 : i32
    %c0_i32_1 = arith.constant 0 : i32
    return %c0_i32, %c0_i32_0 : i32, i32
  }
  func.func @transform_12(%arg0: i32, %arg1: i32) -> (i32, i32) {
    %c0_i32 = arith.constant 0 : i32
    %c0_i32_0 = arith.constant 0 : i32
    %c0_i32_1 = arith.constant 0 : i32
    return %c0_i32, %c0_i32_0 : i32, i32
  }
  func.func @transform_13(%arg0: i32, %arg1: i32) -> (i32, i32) {
    %c0_i32 = arith.constant 0 : i32
    %c0_i32_0 = arith.constant 0 : i32
    %c0_i32_1 = arith.constant 0 : i32
    return %c0_i32, %c0_i32_0 : i32, i32
  }
  func.func @transform_14(%arg0: i32, %arg1: i32) -> (i32, i32, i32) {
    %c0_i32 = arith.constant 0 : i32
    %c0_i32_0 = arith.constant 0 : i32
    return %arg0, %arg1, %c0_i32 : i32, i32, i32
  }
  func.func @transform_15(%arg0: i32, %arg1: i32) -> (i32, i32, i32, i32) {
    %c0_i32 = arith.constant 0 : i32
    %c0_i32_0 = arith.constant 0 : i32
    %c0_i32_1 = arith.constant 0 : i32
    return %arg0, %c0_i32, %arg1, %c0_i32_0 : i32, i32, i32, i32
  }
}

</mosaic_0001>

<bundles_post_ra>
// kernel: tpu_custom_call.1
= control target key start
LH: loop header
LB: loop body
LE: loop exit
PB: predicated region body
PF: predicated region fallthrough
CT: control target
= control target key end

     0   :  { %s2266_s0 = inlined_call_operand.vmem [shape: f32[2,8,32], index: 0, kind: input, shape index: {}]   ;;  %s2267_s1 = inlined_call_operand.vmem [shape: f32[2,8,32], index: 1, kind: input, shape index: {}]   ;;  %s2268_s2 = inlined_call_operand.hbm [shape: f32[2,1,1,8], index: 2, kind: input, shape index: {}]   ;;  %s2269_s3 = inlined_call_operand.vmem [shape: bf16[32,32], index: 3, kind: input, shape index: {}]   ;;  %s2270_s4 = inlined_call_operand.hbm [shape: bf16[32,64], index: 4, kind: input, shape index: {}]   ;;  %s2271_s5 = inlined_call_operand.hbm [shape: bf16[32,32], index: 5, kind: input, shape index: {}]   ;;  %s2272_s6 = inlined_call_operand.vmem [shape: f32[1,32], index: 6, kind: input, shape index: {}]   ;;  %s2273_s7 = inlined_call_operand.vmem [shape: f32[1,32], index: 7, kind: input, shape index: {}]   ;;  %s2274_s8 = inlined_call_operand.hbm [shape: bf16[32,64], index: 8, kind: input, shape index: {}]   ;;  %s2275_s9 = inlined_call_operand.vmem [shape: f32[1,64], index: 9, kind: input, shape index: {}]   ;;  %s2276_s10 = inlined_call_operand.vmem [shape: bf16[64,32], index: 10, kind: input, shape index: {}]   ;;  %s2277_s11 = inlined_call_operand.vmem [shape: f32[1,32], index: 11, kind: input, shape index: {}]   ;;  %s2278_s12 = inlined_call_operand.vmem [shape: f32[1,32], index: 12, kind: input, shape index: {}]   ;;  %s2279_s13 = inlined_call_operand.vmem [shape: f32[1,32], index: 13, kind: input, shape index: {}]   ;;  %s2280_s14 = inlined_call_operand.hbm [shape: f32[2,8,32], index: 14, kind: output, shape index: {0}]   ;;  %s2281_s15 = inlined_call_operand.hbm [shape: f32[2,4,8,8], index: 15, kind: output, shape index: {1}]  }
   0x1   :  { %2287 = sst [smem:[#allocation19_spill]] %s2266_s0 }
   0x2   :  { %2288 = sst [smem:[#allocation20_spill]] %s2267_s1 }
   0x3   :  { %2289 = sst [smem:[#allocation21_spill]] %s2268_s2 }
   0x4   :  { %2290 = sst [smem:[#allocation22_spill]] %s2269_s3 }
   0x5   :  { %2291 = sst [smem:[#allocation23_spill]] %s2270_s4 }
   0x6   :  { %2292 = sst [smem:[#allocation24_spill]] %s2271_s5 }
   0x7   :  { %2293 = sst [smem:[#allocation25_spill]] %s2274_s8 }
   0x8   :  { %2294 = sst [smem:[#allocation26_spill]] %s2278_s12 }
   0x9   :  { %2295 = sst [smem:[#allocation27_spill]] %s2279_s13 }
   0xa   :  { %2296 = sst [smem:[#allocation28_spill]] %s2280_s14 }
   0xb   :  { %2297 = sst [smem:[#allocation29_spill]] %s2281_s15 }
   0xc   :  { %21 = vsyncpa [#allocation3], 0 }
   0xd   :  { %23 = vsyncpa [#allocation3 + $0x1], 0 }
   0xe   :  { %24 = vsyncpa [#allocation6], 0 }
   0xf   :  { %25 = vsyncpa [#allocation9], 0 }
  0x10   :  { %26 = vsyncpa [#allocation4], 0 }
  0x11   :  { %28 = vsyncpa [#allocation4 + $0x1], 0 }
  0x12   :  { %29 = vsyncpa [#allocation12], 0 }
  0x13   :  { %31 = vsyncpa [#allocation12 + $0x1], 0  ;;  %s1962_s18 = smov 0   ;;  %s1964_s19 = smov 0  }
  0x14   :  { %s1966_s20 = smov 0   ;;  %s1968_s21 = smov 0  }
  0x15   :  { %s1970_s22 = smov 0   ;;  %s1972_s23 = smov 0  }
  0x16 LB: > { %s2282_s24 = sadd.s32 4294967295, %s1865_s23   ;;  %p1391_p0 = scmp.ge.s32.totalorder %s1865_s23, 1  ;;  %s1865_s23 = sphi %s1972_s23, %s37_s23   ;;  %s1861_s22 = sphi %s1970_s22, %s2325_s22   ;;  %s1857_s21 = sphi %s1968_s21, %s2324_s21   ;;  %s1853_s20 = sphi %s1966_s20, %s2323_s20   ;;  %s1849_s19 = sphi %s1964_s19, %s2322_s19   ;;  %s1845_s18 = sphi %s1962_s18, %s2321_s18  }
  0x17   : > { %p1996_p1 = scmp.eq.s32.totalorder %s2282_s24, 0  ;;  %p421_p2 = scmp.lt.s32.totalorder %s1865_s23, 3 }
  0x18   : > { %s2299_s4 = sld [smem:[#allocation23_spill]]  ;;  %s1867_s30 = smov [#allocation5]  }
  0x19   : > { %p2004_p3 = pnand %p1391_p0, %p421_p2  ;;  %s437_s16 = sshll.u32 %s1867_s30, 4  ;;  %s438_s16 = int_to_ptr.vmem [resolvable:$true] %s437_s16 }
  0x1a   : > { %p1395_p6 = scmp.ge.s32.totalorder %s1865_s23, 2  ;;  %s2302_s5 = sld [smem:[#allocation24_spill]] }
  0x1b   : > { %p1503_p4 = pneg %p2004_p3  ;;  %s1869_s30 = smov 4  }
  0x1c   : > { %s1870_s13 = smov [#allocation7]   ;;  %s2303_s8 = sld [smem:[#allocation25_spill]] }
  0x1d   : > { %p2012_p5 = pnand %p1503_p4, %p1996_p1  ;;  %s451_s14 = sshll.u32 %s1870_s13, 4  ;;  %s452_s14 = int_to_ptr.vmem [resolvable:$true] %s451_s14 }
  0x1e   : > { %s435_s28 = sshll.u32 %s2299_s4, 4  ;;  %s1868_s4 = smov 64   ;;  %s436_s28 = int_to_ptr.hbm [resolvable:$true] %s435_s28 }
  0x1f   : > { %1506 = dma.hbm_to_vmem [thread:$0]  (!%p2012_p5), %s436_s28, 256, %s438_s16, [#allocation6], %s1868_s4, %s1868_s4, %s1869_s30  }
  0x20   : > { %s449_s24 = sshll.u32 %s2302_s5, 4  ;;  %s1871_s27 = smov [#allocation8]   ;;  %s450_s24 = int_to_ptr.hbm [resolvable:$true] %s449_s24 }
  0x21   : > { %1509 = dma.hbm_to_vmem [thread:$0]  (!%p2012_p5), %s450_s24, 256, %s452_s14, [#allocation6], %s1868_s4, %s1868_s4, %s1869_s30  }
  0x22   : > { %s469_s26 = sshll.u32 %s2303_s8, 4  ;;  %s471_s5 = sshll.u32 %s1871_s27, 4  ;;  %s470_s26 = int_to_ptr.hbm [resolvable:$true] %s469_s26  ;;  %s472_s5 = int_to_ptr.vmem [resolvable:$true] %s471_s5 }
  0x23   : > { %1512 = dma.hbm_to_vmem [thread:$0]  (!%p2012_p5), %s470_s26, 256, %s472_s5, [#allocation9], %s1868_s4, %s1868_s4, %s1869_s30  }
  0x24   : > { %s1390_s28 = sadd.s32 4294967294, %s1865_s23   ;;  %s49_s13 = sadd.s32 1, %s1861_s22 }
  0x25   : > { %s110_s16 = sadd.s32 1, %s1853_s20  ;;  %p51_p7 = scmp.ge.s32.totalorder %s49_s13, 2 }
  0x26   : > { %p117_p8 = scmp.ne.s32.totalorder %s1853_s20, %s1849_s19  ;;  %p118_p9 = scmp.eq.s32.totalorder %s1865_s23, 0 }
  0x27   : > { %p123_p10 = scmp.ne.s32.totalorder %s1849_s19, %s1845_s18  ;;  %s2327_s13 = smov (%p51_p7, %s49_s13), 0 }
  0x28   : > { %2304 = sst [smem:[#allocation18_spill]] %s2327_s13  ;;  %p2039_p11 = por %p118_p9, %p117_p8 }
  0x29   : > { %p2045_p12 = por %p1996_p1, %p123_p10  ;;  %s107_s5 = ssub.s32 %s1861_s22, %s2327_s13 }
  0x2a   : > { %s2307_s14 = sadd.s32 4294967295, %s1865_s23   ;;  %p108_p0 = scmp.eq.s32.totalorder %s107_s5, 0 }
  0x2b   : > { %p380_p13 = scmp.eq.s32.totalorder %s2307_s14, 1  ;;  %p386_p2 = scmp.eq.s32.totalorder %s1390_s28, 1 }
  0x2c   : > { %p1527_p5 = scmp.lt.s32.totalorder %s1865_s23, 2  ;;  %s517_s30 = sand.u32 1, %s1853_s20  }
  0x2d   : > { %p2053_p4 = por %p380_p13, %p117_p8  ;;  %p2061_p7 = por %p386_p2, %p123_p10 }
  0x2e   : > { %s2059_s24 = scalar_select %p108_p0, %s1853_s20, %s110_s16  }
  0x2f   : > { %s2310_s2 = sld [smem:[#allocation21_spill]]  ;;  %s520_s13 = scalar_lea.vmem [#allocation2], %s517_s30 }
  0x30   : > { %s527_s14 = sshll.u32 %s520_s13, 4  ;;  %p1514_p8 = pnand %p1527_p5, %p2039_p11  ;;  %s528_s14 = int_to_ptr.vmem [resolvable:$true] %s527_s14 }
  0x31   : > { %s518_s28 = scalar_lea.sflag [#allocation3], %s517_s30  ;;  %s2075_s16 = sand.u32 (!%p2004_p3), 1, %s1849_s19  }
  0x32   : > { %s539_s26 = scalar_lea.sflag (!%p2004_p3), [#allocation3], %s2075_s16 }
  0x33   : > { %536 = sbr.rel (%p2004_p3) target bundleno = 1913 (0x779), region = 76 }
  0x35   : > { %s523_s8 = scalar_lea.hbm %s2310_s2, %s1861_s22 }
  0x36   : > { %s525_s5 = sshll.u32 %s523_s8, 4  ;;  %s526_s5 = int_to_ptr.hbm [resolvable:$true] %s525_s5 }
  0x37   : > { %1516 = dma.hbm_to_vmem [thread:$0]  (!%p1514_p8), %s526_s5, 16, %s528_s14, %s518_s28  }
  0x38   : > { %1824 = dma.done.wait (%p2045_p12), %s539_s26, 16  }
  0x39   : > { %1826 = vsyncadd (%p2045_p12), %s539_s26, 4294967280 }
  0x3a   : > { %1828 = dma.done.wait (%p1996_p1), [#allocation6], 512  }
  0x3b   : > { %1830 = vsyncadd (%p1996_p1), [#allocation6], 4294966784 }
  0x3c   : > { %1832 = dma.done.wait (%p1996_p1), [#allocation9], 256  }
  0x3d   : > { %1834 = vsyncadd (%p1996_p1), [#allocation9], 4294967040  ;;  %p619_p3 = scmp.lt.s32.totalorder %s1857_s21, 1  ;;  %s2311_s1 = sld [smem:[#allocation20_spill]]  ;;  %v1475_v0 = vld [vmem:[#allocation5 + $0x8] sm:$0xff]  ;;  %v1474_v1 = vld [vmem:[#allocation5] sm:$0xff] }
  0x3e   : > { %s2312_s0 = sld [smem:[#allocation19_spill]]  ;;  %693 = vmatpush.bf16.msra.mxu1 %v1475_v0  ;;  %vm650_vm0 = vcmask 261120   ;;  %vm728_vm1 = vcmask 64512   ;;  %s1873_s27 = smov 120   ;;  %v1875_v33 = vmov 0.0   ;;  %vm879_vm3 = vcmask 1043456  }
  0x3f   : > { %s620_s8 = scalar_select %p619_p3, %s1857_s21, 1  ;;  %vm981_vm4 = vcmask 130048   ;;  %vm983_vm5 = vcmask 195584   ;;  %vm1132_vm10 = vcmask 523264  }
  0x40   : > { %s2313_s3 = sld [smem:[#allocation22_spill]]  ;;  %s2314_s13 = scalar_lea.vmem [#allocation2], %s2075_s16 }
  0x41   : > { %s1402_s29 = sshll.u32 %s620_s8, 3  ;;  %s1872_s8 = smov 112   ;;  %v809_v32 = vld [vmem:[%s2314_s13] sm:$0x1] }
  0x42   : > { %694 = vmatpush.bf16.msra.mxu1 %v1474_v1  ;;  %vm810_vm2 = vcmp.ne.f32.partialorder %v809_v32, 0.0  ;;  %s1876_s12 = smov 96   ;;  %s1877_s14 = smov 16  }
  0x43   : > { %s629_s4 = scalar_lea.vmem %s2311_s1, %s1402_s29  ;;  %v811_v34 = vsel %vm810_vm2, -1e+30, %v1875_v33  ;;  %s1879_s28 = smov 24  }
  0x44   : > { %s625_s5 = scalar_lea.vmem %s2312_s0, %s1402_s29  ;;  %v632_v2 = vld [vmem:[%s629_s4] sm:$0xff]  ;;  %s1874_s29 = smov 104   ;;  %v813_v37 = vperm.slane %v811_v34, 0 }
  0x45   : > { %v2105_v5 = vld [vmem:[%s625_s5] sm:$0xff]  ;;  %v667_v6 = vpack.c.bf16 %v632_v2, %v632_v2  ;;  %s1401_s4 = sshll.u32 %s2075_s16, 5  ;;  %s2286_s5 = smov 8  }
  0x46   : > { %v1473_v3 = vld [vmem:[%s2313_s3 + $0x8] sm:$0xff]  ;;  %v1472_v4 = vld [vmem:[%s2313_s3] sm:$0xff]  ;;  %v633_v7 = vpack.c.bf16 %v2105_v5, %v2105_v5  ;;  %s2146_s30 = scalar_lea.vmem [#allocation11], %s1401_s4 }
  0x47   : > { %660 = vmatpush.bf16.msra.mxu0 %v1473_v3  ;;  %1421 = vmatmul.msk.bf16.vlgmr.msra.gmra.mxu1 %vm650_vm0, %v667_v6  ;;  %s1217_s25 = sshll.u32 %s2146_s30, 4  ;;  %s1218_s25 = int_to_ptr.vmem [resolvable:$true] %s1217_s25 }
  0x4b   : > { %661 = vmatpush.bf16.msra.mxu0 %v1472_v4 }
  0x4e   : > { %1412 = vmatmul.msk.bf16.vlgmr.msra.gmra.mxu0 %vm650_vm0, %v633_v7 }
  0xc4   : > { %v696_v8 = vpop.f32.mrf.mxu1 }
  0xc5   : > { %714 = vrot.lane.b32.xlu1 %v696_v8, %s1872_s8  ;;  %711 = vrot.lane.b32.xlu0 %v696_v8, %s1873_s27  ;;  %v2111_v9 = vpack.c.bf16 %v696_v8, %v696_v8 }
  0xc7   : > { %v733_v11 = vsel %vm728_vm1, %v2111_v9, 0 }
  0xc8   : > { %742 = vmatpush.bf16.xpose.msra.mxu2 %v733_v11 }
  0xcb   : > { %v663_v10 = vpop.f32.mrf.mxu0 }
  0xcc   : > { %704 = vrot.lane.b32.xlu2 %v663_v10, %s1872_s8  ;;  %v720_v12 = vpack.c.bf16 %v663_v10, %v663_v10  ;;  %v698_v13 = vpop.f32.mrf.mxu1 }
  0xcd   : > { %717 = vrot.lane.b32.xlu1 %v696_v8, %s1874_s29  ;;  %701 = vrot.lane.b32.xlu0 %v663_v10, %s1873_s27  ;;  %s1189_s27 = scalar_lea.sflag [#allocation12], %s2075_s16 }
  0xcf   : > { %1422 = vmatmul.msk.bf16.vlgmr.msra.gmra.mxu2 %vm728_vm1, %v720_v12  ;;  %v872_v12 = vunpack.c.l.b16 %v2111_v9 }
  0xd3   : > { %v665_v14 = vpop.f32.mrf.mxu0 }
  0xd4   : > { %707 = vrot.lane.b32.xlu2 %v663_v10, %s1874_s29  ;;  %v873_v14 = vpack.c.b16 %v872_v12, %v872_v12 }
 0x126   : > { %v705_v21 = vpop.permute.xlu2 %704 }
 0x127   : > { %v722_v24 = vpack.c.bf16 %v705_v21, %v705_v21 }
 0x12e   : > { %v708_v28 = vpop.permute.xlu2 %707 }
 0x12f   : > { %v723_v29 = vpack.c.bf16 %v708_v28, %v708_v28 }
 0x137   : > { %v715_v15 = vpop.permute.xlu1 %714  ;;  %v712_v16 = vpop.permute.xlu0 %711 }
 0x138   : > { %v2116_v17 = vpack.c.bf16 %v715_v15, %v715_v15  ;;  %v2118_v18 = vpack.c.bf16 %v712_v16, %v712_v16 }
 0x13a   : > { %v752_v19 = vsel %vm728_vm1, %v2118_v18, 0  ;;  %v771_v20 = vsel %vm728_vm1, %v2116_v17, 0  ;;  %v921_v6 = vunpack.c.l.b16 %v2116_v17  ;;  %v897_v7 = vunpack.c.l.b16 %v2118_v18 }
 0x13b   : > { %761 = vmatpush.bf16.xpose.msra.mxu3 %v752_v19  ;;  %780 = vmatpush.bf16.xpose.msrb.mxu0 %v771_v20 }
 0x13c   : > { %v922_v8 = vpack.c.b16 %v921_v6, %v921_v6  ;;  %v898_v10 = vpack.c.b16 %v897_v7, %v897_v7 }
 0x13f   : > { %v718_v22 = vpop.permute.xlu1 %717  ;;  %v702_v23 = vpop.permute.xlu0 %701 }
 0x140   : > { %v2124_v25 = vpack.c.bf16 %v718_v22, %v718_v22  ;;  %v721_v26 = vpack.c.bf16 %v702_v23, %v702_v23 }
 0x142   : > { %1423 = vmatmul.msk.bf16.vlgmr.msra.gmra.mxu3 %vm728_vm1, %v721_v26  ;;  %1424 = vmatmul.msk.bf16.vlgmr.msrb.gmra.mxu0 %vm728_vm1, %v722_v24  ;;  %v790_v27 = vsel %vm728_vm1, %v2124_v25, 0  ;;  %v945_v11 = vunpack.c.l.b16 %v2124_v25 }
 0x143   : > { %799 = vmatpush.bf16.xpose.msrb.mxu1 %v790_v27 }
 0x144   : > { %v946_v13 = vpack.c.b16 %v945_v11, %v945_v11 }
 0x14a   : > { %1425 = vmatmul.msk.bf16.vlgmr.msrb.gmra.mxu1 %vm728_vm1, %v723_v29 }
 0x152   : > { %v744_v30 = vpop.f32.mrf.mxu2 }
 0x153   : > { %v805_v48 = vmul.f32 0.35355338, %v744_v30 }
 0x155   : > { %v815_v52 = vadd.f32 %v813_v37, %v805_v48 }
 0x157   : > { %v819_v53 = vsel %vm728_vm1, %v815_v52, -inf }
 0x15a   : > { %v746_v31 = vpop.f32.mrf.mxu2 }
 0x1bf   : > { %v782_v35 = vpop.f32.mrf.mxu0 }
 0x1c0   : > { %v807_v36 = vmul.f32 0.35355338, %v782_v35 }
 0x1c2   : > { %v817_v38 = vadd.f32 %v813_v37, %v807_v36 }
 0x1c4   : > { %v825_v39 = vsel %vm728_vm1, %v817_v38, -inf }
 0x1c5   : > { %v763_v40 = vpop.f32.mrf.mxu3  ;;  %826 = vmax.xlane.f32.xlu1 %v825_v39 }
 0x1c6   : > { %v806_v41 = vmul.f32 0.35355338, %v763_v40 }
 0x1c7   : > { %v784_v42 = vpop.f32.mrf.mxu0  ;;  %v801_v43 = vpop.f32.mrf.mxu1 }
 0x1c8   : > { %v808_v44 = vmul.f32 0.35355338, %v801_v43  ;;  %v816_v45 = vadd.f32 %v813_v37, %v806_v41 }
 0x1ca   : > { %v822_v46 = vsel %vm728_vm1, %v816_v45, -inf  ;;  %v818_v47 = vadd.f32 %v813_v37, %v808_v44 }
 0x1cb   : > { %823 = vmax.xlane.f32.xlu0 %v822_v46 }
 0x1cc   : > { %v828_v49 = vsel %vm728_vm1, %v818_v47, -inf }
 0x1cd   : > { %829 = vmax.xlane.f32.xlu2 %v828_v49  ;;  %v765_v50 = vpop.f32.mrf.mxu3 }
 0x1cf   : > { %v803_v51 = vpop.f32.mrf.mxu1 }
 0x1d0   : > { %v1477_v51 = vld [vmem:[#allocation7 + $0x8] sm:$0xff] }
 0x1d5   : > { %820 = vmax.xlane.f32.xlu2 %v819_v53 }
 0x238   : > { %v827_v54 = vpop.xlane.xlu1 %826 }
 0x239   : > { %v833_v55 = vsub.f32 %v817_v38, %v827_v54 }
 0x23b   : > { %v839_v56 = vmul.f32 1.442695, %v833_v55 }
 0x23d   : > { %1601 = vpow2.f32 %v839_v56 }
 0x23e   : > { %v824_v57 = vpop.xlane.xlu0 %823 }
 0x23f   : > { %v832_v58 = vsub.f32 %v816_v45, %v824_v57 }
 0x240   : > { %v830_v59 = vpop.xlane.xlu2 %829 }
 0x241   : > { %v837_v60 = vmul.f32 1.442695, %v832_v58  ;;  %v834_v61 = vsub.f32 %v818_v47, %v830_v59 }
 0x243   : > { %v1602_v62 = vpop.eup %1601  ;;  %1603 = vpow2.f32 %v837_v60  ;;  %v841_v63 = vmul.f32 1.442695, %v834_v61 }
 0x244   : > { %v849_v0 = vsel %vm728_vm1, %v1602_v62, 0.0 }
 0x245   : > { %1605 = vpow2.f32 %v841_v63  ;;  %850 = vadd.xlane.f32.xlu1 %v849_v0  ;;  %v1880_v0 = vmov 32.0  }
 0x248   : > { %v821_v15 = vpop.xlane.xlu2 %820 }
 0x249   : > { %v1604_v1 = vpop.eup %1603  ;;  %v831_v16 = vsub.f32 %v815_v52, %v821_v15  ;;  %v1476_v52 = vld [vmem:[#allocation7] sm:$0xff] }
 0x24a   : > { %v846_v2 = vsel %vm728_vm1, %v1604_v1, 0.0  ;;  %v1483_v15 = vld [vmem:[%s2276_s10 + $0x18] sm:$0xff] }
 0x24b   : > { %v1606_v3 = vpop.eup %1605  ;;  %847 = vadd.xlane.f32.xlu0 %v846_v2  ;;  %v835_v19 = vmul.f32 1.442695, %v831_v16 }
 0x24c   : > { %v852_v4 = vsel %vm728_vm1, %v1606_v3, 0.0 }
 0x24d   : > { %853 = vadd.xlane.f32.xlu2 %v852_v4  ;;  %1607 = vpow2.f32 %v835_v19 }
 0x253   : > { %v1608_v17 = vpop.eup %1607 }
 0x254   : > { %v843_v18 = vsel %vm728_vm1, %v1608_v17, 0.0 }
 0x25e   : > { %923 = vrot.lane.b32.xlu1 %v922_v8, %s1876_s12 }
 0x25f   : > { %899 = vrot.lane.b32.xlu0 %v898_v10, %s1876_s12 }
 0x265   : > { %947 = vrot.lane.b32.xlu2 %v946_v13, %s1876_s12  ;;  %v1479_v13 = vld [vmem:[#allocation8 + $0x8] sm:$0xff] }
 0x266   : > { %874 = vrot.lane.b32.xlu1 %v873_v14, %s1876_s12  ;;  %v1478_v14 = vld [vmem:[#allocation8] sm:$0xff]  ;;  %s1484_s12 = sshll.u32 %s1857_s21, 5 }
 0x289   : > { %844 = vadd.xlane.f32.xlu0 %v843_v18 }
 0x2b8   : > { %v851_v20 = vpop.xlane.xlu1 %850 }
 0x2b9   : > { %1609 = vrcp.f32 %v851_v20 }
 0x2be   : > { %v848_v21 = vpop.xlane.xlu0 %847 }
 0x2bf   : > { %v1610_v22 = vpop.eup %1609  ;;  %1611 = vrcp.f32 %v848_v21 }
 0x2c0   : > { %v861_v23 = vmul.f32 %v1610_v22, %v1602_v62  ;;  %v854_v9 = vpop.xlane.xlu2 %853 }
 0x2c1   : > { %1613 = vrcp.f32 %v854_v9 }
 0x2c2   : > { %865 = vst.msk [vmem:[%s2146_s30 + $0x10] sm:$0xff] %vm728_vm1, %v861_v23  ;;  %v869_v35 = vpack.c.bf16 %v861_v23, %v861_v23 }
 0x2c5   : > { %v1612_v24 = vpop.eup %1611 }
 0x2c6   : > { %v860_v25 = vmul.f32 %v1612_v24, %v1604_v1 }
 0x2c7   : > { %v1614_v26 = vpop.eup %1613 }
 0x2c8   : > { %864 = vst.msk [vmem:[%s2146_s30 + $0x8] sm:$0xff] %vm728_vm1, %v860_v25  ;;  %v862_v27 = vmul.f32 %v1614_v26, %v1606_v3  ;;  %v948_v28 = vpop.permute.xlu2 %947  ;;  %v868_v36 = vpack.c.bf16 %v860_v25, %v860_v25  ;;  %v1595_v25 = vld [vmem:[%s2272_s6] ss:$0 sm:$0xff] }
 0x2c9   : > { %v953_v29 = vsel %vm879_vm3, %v948_v28, 0 }
 0x2ca   : > { %866 = vst.msk [vmem:[%s2146_s30 + $0x18] sm:$0xff] %vm728_vm1, %v862_v27  ;;  %v870_v30 = vpack.c.bf16 %v862_v27, %v862_v27  ;;  %962 = vmatpush.bf16.msra.mxu1 %v953_v29  ;;  %v1596_v27 = vld [vmem:[%s2273_s7] ss:$0 sm:$0xff] }
 0x2cd   : > { %1429 = vmatmul.msk.bf16.vlgmr.msra.gmra.mxu1 %vm728_vm1, %v870_v30 }
 0x2d0   : > { %v924_v31 = vpop.permute.xlu1 %923 }
 0x2d1   : > { %v929_v32 = vsel %vm879_vm3, %v924_v31, 0  ;;  %v900_v33 = vpop.permute.xlu0 %899 }
 0x2d2   : > { %938 = vmatpush.bf16.msra.mxu0 %v929_v32  ;;  %v905_v34 = vsel %vm879_vm3, %v900_v33, 0  ;;  %v1481_v32 = vld [vmem:[%s2276_s10 + $0x8] sm:$0xff]  ;;  %v1480_v33 = vld [vmem:[%s2276_s10] sm:$0xff] }
 0x2d3   : > { %914 = vmatpush.bf16.msrb.mxu3 %v905_v34  ;;  %v1597_v34 = vld [vmem:[%s2275_s9] ss:$0 sm:$0xff] }
 0x2d5   : > { %1428 = vmatmul.msk.bf16.vlgmr.msra.gmra.mxu0 %vm728_vm1, %v869_v35 }
 0x2d6   : > { %1427 = vmatmul.msk.bf16.vlgmr.msrb.gmra.mxu3 %vm728_vm1, %v868_v36  ;;  %1140 = vmatpush.bf16.msrb.mxu0 %v1483_v15 }
 0x2d7   : > { %1087 = vmatpush.bf16.msra.mxu3 %v1479_v13 }
 0x2d8   : > { %v875_v37 = vpop.permute.xlu1 %874 }
 0x2d9   : > { %v881_v38 = vsel %vm879_vm3, %v875_v37, 0 }
 0x2da   : > { %890 = vmatpush.bf16.msrb.mxu2 %v881_v38 }
 0x2db   : > { %1088 = vmatpush.bf16.msra.mxu3 %v1478_v14 }
 0x2de   : > { %1011 = vmatpush.bf16.msra.mxu2 %v1477_v51 }
 0x2e2   : > { %1012 = vmatpush.bf16.msra.mxu2 %v1476_v52 }
 0x2fc   : > { %v845_v39 = vpop.xlane.xlu0 %844 }
 0x2fd   : > { %1615 = vrcp.f32 %v845_v39 }
 0x2fe   : > { %1617 = vrcp.f32 %v1880_v0 }
 0x303   : > { %v1616_v40 = vpop.eup %1615 }
 0x304   : > { %v859_v41 = vmul.f32 %v1616_v40, %v1608_v17  ;;  %v1618_v1 = vpop.eup %1617  ;;  %v1482_v17 = vld [vmem:[%s2276_s10 + $0x10] sm:$0xff]  ;;  %v1598_v40 = vld [vmem:[%s2277_s11] ss:$0 sm:$0xff] }
 0x305   : > { %v1022_v2 = vmul.f32 32.0, %v1618_v1  ;;  %vm1026_vm6 = vweird.f32 %v1618_v1  ;;  %1141 = vmatpush.bf16.msrb.mxu0 %v1482_v17 }
 0x306   : > { %863 = vst.msk [vmem:[%s2146_s30] sm:$0xff] %vm728_vm1, %v859_v41  ;;  %v867_v42 = vpack.c.bf16 %v859_v41, %v859_v41 }
 0x307   : > { %v1023_v3 = vsub.f32 1.0, %v1022_v2 }
 0x308   : > { %1426 = vmatmul.msk.bf16.vlgmr.msrb.gmra.mxu2 %vm728_vm1, %v867_v42 }
 0x309   : > { %v1024_v4 = vmul.f32 %v1618_v1, %v1023_v3  ;;  %1142 = vmatpush.bf16.msrb.mxu0 %v1481_v32 }
 0x30b   : > { %v1025_v6 = vadd.f32 %v1618_v1, %v1024_v4 }
 0x30d   : > { %v2169_v7 = vsel %vm1026_vm6, %v1618_v1, %v1025_v6  ;;  %1143 = vmatpush.bf16.msrb.mxu0 %v1480_v33 }
 0x34a   : > { %v964_v43 = vpop.f32.mrf.mxu1 }
 0x352   : > { %v940_v44 = vpop.f32.mrf.mxu0  ;;  %v966_v45 = vpop.f32.mrf.mxu1 }
 0x353   : > { %973 = vrot.lane.b32.xlu1 %v940_v44, %s1877_s14 }
 0x359   : > { %v916_v46 = vpop.f32.mrf.mxu3 }
 0x35a   : > { %969 = vrot.lane.b32.xlu2 %v916_v46, %s2286_s5  ;;  %v942_v47 = vpop.f32.mrf.mxu0 }
 0x361   : > { %v918_v48 = vpop.f32.mrf.mxu3 }
 0x362   : > { %977 = vrot.lane.b32.xlu2 %v964_v43, %s1879_s28  ;;  %s2315_s28 = sld [smem:[#allocation29_spill]] }
 0x368   : > { %s1216_s26 = scalar_lea.hbm %s2315_s28, %s1484_s12  ;;  %s1763_s1 = scalar_lea.hbm %s2315_s28, 64 }
 0x369   : > { %s1219_s8 = sshll.u32 %s1216_s26, 4  ;;  %s1220_s8 = int_to_ptr.hbm [resolvable:$true] %s1219_s8 }
 0x36a   : > { %s1757_s29 = sshra.s32 %s1220_s8, 4  ;;  %s1758_s29 = int_to_ptr.hbm [resolvable:$true] %s1757_s29 }
 0x36b   : > { %s1759_s13 = scalar_lea.hbm %s1758_s29, 32  ;;  %p1764_p11 = scmp.lt.s32.totalorder %s1758_s29, %s2315_s28 }
 0x36c   : > { %p1760_p1 = scmp.ne.s32.totalorder %s1758_s29, %s1759_s13  ;;  %p1765_p12 = scmp.lt.s32.totalorder %s1763_s1, %s1759_s13 }
 0x36e   : > { %p1761_p9 = pnand %p1760_p1, %p2053_p4  ;;  %p1766_p13 = por %p1765_p12, %p1764_p11 }
 0x370   : > { %p1762_p10 = pneg %p1761_p9 }
 0x372   : > { %p1767_p0 = pnand %p1766_p13, %p1762_p10 }
 0x38b   : > { %v892_v49 = vpop.f32.mrf.mxu2 }
 0x393   : > { %v894_v50 = vpop.f32.mrf.mxu2 }
 0x3b4   : > { %v970_v53 = vpop.permute.xlu2 %969 }
 0x3b5   : > { %v980_v54 = vsel %vm728_vm1, %v892_v49, %v970_v53 }
 0x3bc   : > { %v978_v56 = vpop.permute.xlu2 %977 }
 0x3c5   : > { %v974_v55 = vpop.permute.xlu1 %973 }
 0x3c6   : > { %v982_v57 = vsel %vm981_vm4, %v980_v54, %v974_v55 }
 0x3c7   : > { %v984_v58 = vsel %vm983_vm5, %v982_v57, %v978_v56 }
 0x3c8   : > { %v985_v59 = vpack.c.bf16 %v984_v58, %v984_v58 }
 0x3ca   : > { %1438 = vmatmul.msk.bf16.vlgmr.msra.gmra.mxu2 %vm650_vm0, %v985_v59 }
 0x44d   : > { %v1014_v60 = vpop.f32.mrf.mxu2 }
 0x44e   : > { %v1015_v61 = vadd.f32 %v1014_v60, %v2105_v5 }
 0x450   : > { %v1018_v62 = vsel %vm650_vm0, %v1015_v61, 0.0 }
 0x451   : > { %1019 = vadd.xlane.f32.xlu1 %v1018_v62 }
 0x455   : > { %v1016_v63 = vpop.f32.mrf.mxu2 }
 0x4c4   : > { %v1020_v8 = vpop.xlane.xlu1 %1019 }
 0x4c5   : > { %v1028_v10 = vmul.f32 %v2169_v7, %v1020_v8 }
 0x4c7   : > { %v1029_v11 = vsub.f32 %v1015_v61, %v1028_v10 }
 0x4c9   : > { %v1030_v12 = vmul.f32 %v1029_v11, %v1029_v11 }
 0x4cb   : > { %v1031_v5 = vsel %vm650_vm0, %v1030_v12, 0.0 }
 0x4cc   : > { %1032 = vadd.xlane.f32.xlu2 %v1031_v5 }
 0x53f   : > { %v1033_v16 = vpop.xlane.xlu2 %1032 }
 0x540   : > { %v1034_v19 = vmul.f32 %v1033_v16, %v2169_v7 }
 0x542   : > { %v1035_v18 = vadd.f32 1e-12, %v1034_v19 }
 0x544   : > { %1619 = vrsqrt.f32 %v1035_v18  ;;  %vm1042_vm8 = vweird.f32 %v1035_v18 }
 0x54a   : > { %v1620_v20 = vpop.eup %1619 }
 0x54b   : > { %v1037_v21 = vmul.f32 %v1620_v20, %v1035_v18  ;;  %vm1043_vm7 = vweird.f32 %v1620_v20 }
 0x54c   : > { %vm1044_vm9 = vmor %vm1042_vm8, %vm1043_vm7 }
 0x54d   : > { %v1038_v22 = vmul.f32 %v1620_v20, %v1037_v21 }
 0x54f   : > { %v1039_v23 = vmul.f32 0.5, %v1038_v22 }
 0x551   : > { %v1040_v9 = vsub.f32 1.5, %v1039_v23 }
 0x553   : > { %v1041_v24 = vmul.f32 %v1620_v20, %v1040_v9 }
 0x555   : > { %v1045_v26 = vsel %vm1044_vm9, %v1620_v20, %v1041_v24 }
 0x556   : > { %v1046_v28 = vmul.f32 %v1045_v26, %v1029_v11 }
 0x558   : > { %v1051_v29 = vmul.f32 %v1595_v25, %v1046_v28 }
 0x55a   : > { %v1056_v30 = vadd.f32 %v1596_v27, %v1051_v29 }
 0x55c   : > { %v1057_v31 = vpack.c.bf16 %v1056_v30, %v1056_v30 }
 0x55e   : > { %1447 = vmatmul.msk.bf16.vlgmr.msra.gmra.mxu3 %vm650_vm0, %v1057_v31 }
 0x5e1   : > { %v1090_v35 = vpop.f32.mrf.mxu3 }
 0x5e2   : > { %v1091_v36 = vadd.f32 %v1597_v34, %v1090_v35 }
 0x5e4   : > { %v1094_v37 = vmax.f32 %v1091_v36, 0.0 }
 0x5e6   : > { %v1095_v38 = vpack.c.bf16 %v1094_v37, %v1094_v37 }
 0x5e8   : > { %1464 = vmatmul.msk.bf16.vlgmr.msrb.gmra.mxu0 %vm1132_vm10, %v1095_v38 }
 0x5e9   : > { %v1092_v39 = vpop.f32.mrf.mxu3 }
 0x665   : > { %v1145_v41 = vpop.f32.mrf.mxu0 }
 0x666   : > { %v1146_v42 = vadd.f32 %v1598_v40, %v1145_v41 }
 0x668   : > { %v1149_v43 = vadd.f32 %v1146_v42, %v1056_v30 }
 0x66a   : > { %v1150_v44 = vsel %vm650_vm0, %v1149_v43, 0.0 }
 0x66b   : > { %1151 = vadd.xlane.f32.xlu0 %v1150_v44 }
 0x66d   : > { %v1147_v45 = vpop.f32.mrf.mxu0 }
 0x6de   : > { %v1152_v46 = vpop.xlane.xlu0 %1151 }
 0x6df   : > { %v1153_v47 = vmul.f32 %v1152_v46, %v2169_v7 }
 0x6e1   : > { %v1154_v48 = vsub.f32 %v1149_v43, %v1153_v47 }
 0x6e3   : > { %v1155_v49 = vmul.f32 %v1154_v48, %v1154_v48 }
 0x6e5   : > { %v1156_v50 = vsel %vm650_vm0, %v1155_v49, 0.0 }
 0x6e6   : > { %1157 = vadd.xlane.f32.xlu0 %v1156_v50 }
 0x6e7   : > { %1770 = shalt.err (!%p1767_p0)
}
 0x6e8   : > { %s1881_s30 = smov 128   ;;  %s2316_s12 = smov 8  }
 0x6e9   : > { %1500 = dma.vmem_to_hbm [thread:$0]  (%p2053_p4), %s1218_s25, 512, %s1220_s8, %s1189_s27, %s1881_s30, %s1881_s30, %s2316_s12  }
 0x6ea   : > { %s1400_s0 = sshll.u32 %s2075_s16, 3  ;;  %s1467_s1 = sshll.u32 %s1857_s21, 3 }
 0x6eb   : > { %s2317_s5 = sld [smem:[#allocation26_spill]]  ;;  %s611_s21 = scalar_lea.vmem [#allocation10], %s1400_s0 }
 0x6ec   : > { %s2318_s26 = sld [smem:[#allocation28_spill]]  ;;  %s1202_s13 = sshll.u32 %s611_s21, 4  ;;  %s1203_s13 = int_to_ptr.vmem [resolvable:$true] %s1202_s13 }
 0x6ed   : > { %s2319_s29 = sld [smem:[#allocation27_spill]]  ;;  %s1184_s12 = scalar_lea.sflag [#allocation4], %s2075_s16 }
 0x6f1   : > { %v1599_v60 = vld [vmem:[%s2317_s5] ss:$0 sm:$0xff] }
 0x6f2   : > { %s1200_s25 = scalar_lea.hbm %s2318_s26, %s1467_s1  ;;  %s1791_s0 = scalar_lea.hbm %s2318_s26, 16 }
 0x6f3   : > { %v1600_v63 = vld [vmem:[%s2319_s29] ss:$0 sm:$0xff]  ;;  %s1204_s30 = sshll.u32 %s1200_s25, 4  ;;  %s1205_s30 = int_to_ptr.hbm [resolvable:$true] %s1204_s30 }
 0x6f4   : > { %s1785_s2 = sshra.s32 %s1205_s30, 4  ;;  %s1786_s2 = int_to_ptr.hbm [resolvable:$true] %s1785_s2 }
 0x6f5   : > { %s1787_s1 = scalar_lea.hbm %s1786_s2, 8  ;;  %p1792_p3 = scmp.lt.s32.totalorder %s1786_s2, %s2318_s26 }
 0x6f6   : > { %p1788_p2 = scmp.ne.s32.totalorder %s1786_s2, %s1787_s1  ;;  %p1793_p1 = scmp.lt.s32.totalorder %s1791_s0, %s1787_s1 }
 0x6f8   : > { %p1789_p5 = pnand %p1788_p2, %p2053_p4  ;;  %p1794_p9 = por %p1793_p1, %p1792_p3 }
 0x6fa   : > { %p1790_p8 = pneg %p1789_p5 }
 0x6fc   : > { %p1795_p10 = pnand %p1794_p9, %p1790_p8 }
 0x759   : > { %v1158_v51 = vpop.xlane.xlu0 %1157 }
 0x75a   : > { %v1159_v52 = vmul.f32 %v1158_v51, %v2169_v7 }
 0x75c   : > { %v1160_v53 = vadd.f32 1e-12, %v1159_v52 }
 0x75e   : > { %1621 = vrsqrt.f32 %v1160_v53  ;;  %vm1167_vm12 = vweird.f32 %v1160_v53 }
 0x764   : > { %v1622_v54 = vpop.eup %1621 }
 0x765   : > { %v1162_v55 = vmul.f32 %v1622_v54, %v1160_v53  ;;  %vm1168_vm11 = vweird.f32 %v1622_v54 }
 0x766   : > { %vm1169_vm13 = vmor %vm1167_vm12, %vm1168_vm11 }
 0x767   : > { %v1163_v56 = vmul.f32 %v1622_v54, %v1162_v55 }
 0x769   : > { %v1164_v57 = vmul.f32 0.5, %v1163_v56 }
 0x76b   : > { %v1165_v58 = vsub.f32 1.5, %v1164_v57 }
 0x76d   : > { %v1166_v59 = vmul.f32 %v1622_v54, %v1165_v58 }
 0x76f   : > { %v1170_v61 = vsel %vm1169_vm13, %v1622_v54, %v1166_v59 }
 0x770   : > { %v1171_v62 = vmul.f32 %v1170_v61, %v1154_v48 }
 0x772   : > { %v1176_v0 = vmul.f32 %v1599_v60, %v1171_v62 }
 0x774   : > { %v1181_v1 = vadd.f32 %v1600_v63, %v1176_v0 }
 0x776   : > { %1182 = vst.msk [vmem:[%s611_s21] sm:$0xff] %vm650_vm0, %v1181_v1 }
 0x777   : > { %1798 = shalt.err (!%p1795_p10)
}
 0x778   : > { %1499 = dma.vmem_to_hbm [thread:$0]  (%p2053_p4), %s1203_s13, 128, %s1205_s30, %s1184_s12  }
 0x779 PF: > { %s1234_s16 = sand.u32 1, %s1845_s18   ;;  %p1518_p11 = pnand %p1395_p6, %p2061_p7 }
 0x77a   : > { %s1235_s25 = scalar_lea.sflag [#allocation4], %s1234_s16 }
 0x77b   : > { %p1519_p12 = pneg %p1518_p11 }
 0x77d   : > { %1836 = dma.done.wait (%p1519_p12), %s1235_s25, 128  }
 0x77e   : > { %1838 = vsyncadd (%p1519_p12), %s1235_s25, 4294967168  ;;  %s1245_s8 = scalar_lea.sflag [#allocation12], %s1234_s16 }
 0x77f   : > { %1840 = dma.done.wait (%p1519_p12), %s1245_s8, 512  }
 0x780   : > { %1842 = vsyncadd (%p1519_p12), %s1245_s8, 4294966784  ;;  %s37_s23 = sadd.s32 1, %s1865_s23   ;;  %s2320_s15 = sld [smem:[#allocation18_spill]] }
 0x781   : > { %p34_p13 = scmp.ge.s32.totalorder %s37_s23, 4   ;;  %s2321_s18 = smov %s1849_s19 }
 0x782   : > { %s2322_s19 = smov %s1853_s20  ;;  %s2323_s20 = smov %s2059_s24 }
 0x783   : > { %s2324_s21 = smov %s1861_s22  ;;  %36 = sbr.rel (!%p34_p13) target bundleno = 22 (0x16), region = 156 }
 0x786   : > { %s2325_s22 = smov %s2320_s15 }
 0x788   :  { %1251 = vsyncpa [#allocation3], 1 }
 0x789   :  { %1253 = vsyncpa [#allocation3 + $0x1], 1 }
 0x78a   :  { %1254 = vsyncpa [#allocation6], 1 }
 0x78b   :  { %1255 = vsyncpa [#allocation9], 1 }
 0x78c   :  { %1256 = vsyncpa [#allocation4], 1 }
 0x78d   :  { %1258 = vsyncpa [#allocation4 + $0x1], 1 }
 0x78e   :  { %1259 = vsyncpa [#allocation12], 1 }
 0x78f   :  { %1261 = vsyncpa [#allocation12 + $0x1], 1 }

</bundles_post_ra>
